<compile_context>
chip_gen: v7x
topology: tpu7x:2x2x1
jax: 0.10.0
libtpu: 0.0.40
codegen_flags: <defaults>
</compile_context>

<pallas_src>
import functools
import math

import jax
import jax.numpy as jnp
from jax.experimental import pallas as pl
from jax.experimental.pallas import tpu as pltpu

HIDDEN_DIM = 128
TIME_EMBED_DIM = 64
HALF_DIM = TIME_EMBED_DIM // 2
TWO_PI = 2.0 * math.pi


def _silu(z):
    # Single-EUP-op formulation: sigmoid(z) = 0.5*(tanh(z/2)+1)  ->  one tanh push.
    return 0.5 * z * (jnp.tanh(0.5 * z) + 1.0)


def _reduce_angle(ang):
    # Range-reduce to ~[-pi, pi). Applied identically in kernel and mirrored
    # reference; ~1e-4 rad deviation from the unreduced PyTorch math for t<=1000.
    return ang - TWO_PI * jnp.floor(ang / TWO_PI + 0.5)


# ---------------------------------------------------------------------------
# Pallas kernel: fused timestep embedding + full MLP forward for one batch tile
# ---------------------------------------------------------------------------
def torsion_mlp_kernel(tx_ref, fp_ref,
                       wte1_ref, bte1_ref,
                       wte2_ref, bte2_ref,
                       win_ref, bin_ref,
                       wh1_ref, bh1_ref,
                       wh2_ref, bh2_ref,
                       wout_ref, bout_ref,
                       o_ref, *, eltwise_dtype):
    f32 = jnp.float32
    bf16 = jnp.bfloat16
    cdt = eltwise_dtype                      # f32 on v5e, bf16 on v6e/v7x

    # Packed per-row input: [t, x0, x1, pad]
    t = tx_ref[:, 0:1]                       # (TM, 1) f32
    x0 = tx_ref[:, 1:2]
    x1 = tx_ref[:, 2:3]

    # --- fused sinusoidal timestep embedding via the phase trick:
    #     emb64 = sin(t*freq64 + phase64) == [sin(t*f), cos(t*f)]
    ang = _reduce_angle(t * fp_ref[0:1, :] + fp_ref[1:2, :])       # (TM, 64)
    emb = jnp.sin(ang).astype(bf16)

    # --- time_embed: Linear(64->128) -> SiLU -> Linear(128->128) (single K=64 pass)
    te = jnp.dot(emb, wte1_ref[...], preferred_element_type=f32) + bte1_ref[...]
    te = _silu(te.astype(cdt))
    te = (jnp.dot(te.astype(bf16), wte2_ref[...], preferred_element_type=f32)
          + bte2_ref[...]).astype(cdt)

    # --- input_layer: Linear(2->128) as two VPU FMAs (a K=2 matmul wastes the MXU)
    h = x0 * win_ref[0:1, :] + x1 * win_ref[1:2, :] + bin_ref[...]
    h = _silu(h.astype(cdt))

    # --- hidden blocks: h = SiLU(Linear(h + t_emb))
    h = _silu((jnp.dot((h + te).astype(bf16), wh1_ref[...],
                       preferred_element_type=f32) + bh1_ref[...]).astype(cdt))
    h = _silu((jnp.dot((h + te).astype(bf16), wh2_ref[...],
                       preferred_element_type=f32) + bh2_ref[...]).astype(cdt))

    # --- output_layer: Linear(128->2). Lane-width 2 -> masked vst; negligible
    # (TM/8 vst.msk vs ~6*TM/8 vmatmul pushes) and 64x less HBM writeback than
    # lane-padding, so left as-is per review.
    o_ref[...] = (jnp.dot(h.astype(bf16), wout_ref[...],
                          preferred_element_type=f32) + bout_ref[...]
                  ).astype(o_ref.dtype)


# ---------------------------------------------------------------------------
# Parameter init (deterministic, PyTorch-Linear-like uniform(+-1/sqrt(fan_in)))
# Weights stored as (in_features, out_features) so forward does x @ W + b.
# ---------------------------------------------------------------------------
def init_params(key):
    def linear(k, fan_in, fan_out):
        kw, kb = jax.random.split(k)
        bound = 1.0 / math.sqrt(fan_in)
        w = jax.random.uniform(kw, (fan_in, fan_out), jnp.float32, -bound, bound)
        b = jax.random.uniform(kb, (1, fan_out), jnp.float32, -bound, bound)
        return w, b

    keys = jax.random.split(key, 6)
    p = {}
    p["wte1"], p["bte1"] = linear(keys[0], TIME_EMBED_DIM, HIDDEN_DIM)
    p["wte2"], p["bte2"] = linear(keys[1], HIDDEN_DIM, HIDDEN_DIM)
    p["win"],  p["bin"]  = linear(keys[2], 2, HIDDEN_DIM)
    p["wh1"],  p["bh1"]  = linear(keys[3], HIDDEN_DIM, HIDDEN_DIM)
    p["wh2"],  p["bh2"]  = linear(keys[4], HIDDEN_DIM, HIDDEN_DIM)
    p["wout"], p["bout"] = linear(keys[5], HIDDEN_DIM, 2)
    return p


def prepare_kernel_params(params):
    """Kernel-ready params: bf16 MXU weights, fused freq/phase table, f32 biases."""
    bf16 = jnp.bfloat16
    freqs = jnp.exp(jnp.arange(HALF_DIM, dtype=jnp.float32)
                    * (-math.log(10000.0) / (HALF_DIM - 1)))            # (32,)
    freq64 = jnp.concatenate([freqs, freqs])                            # (64,)
    phase64 = jnp.concatenate([jnp.zeros((HALF_DIM,), jnp.float32),
                               jnp.full((HALF_DIM,), 0.5 * math.pi, jnp.float32)])
    fp = jnp.stack([freq64, phase64], axis=0)                           # (2, 64)
    return dict(
        fp=fp,
        wte1=params["wte1"].astype(bf16), bte1=params["bte1"],          # (64,128)
        wte2=params["wte2"].astype(bf16), bte2=params["bte2"],
        win=params["win"], bin=params["bin"],                           # VPU path f32
        wh1=params["wh1"].astype(bf16), bh1=params["bh1"],
        wh2=params["wh2"].astype(bf16), bh2=params["bh2"],
        wout=params["wout"].astype(bf16), bout=params["bout"],
    )


def _round_up(n, m):
    return ((n + m - 1) // m) * m


def _cdiv(a, b):
    return (a + b - 1) // b


def _bf16_eltwise_ok():
    # bf16 VPU/EUP exists on v6e/v7x; keep f32 elementwise on v5e and earlier
    # (and on anything we cannot identify).
    try:
        dk = jax.devices()[0].device_kind.lower()
    except Exception:
        return False
    return ("v6" in dk) or ("v7" in dk) or ("7x" in dk)


# ---------------------------------------------------------------------------
# Wrapper: batch grid (>=2 blocks when possible) + parallel dimension semantics
# ---------------------------------------------------------------------------
def simple_torsion_diffusion_forward(x, t, params, *, block_rows=4096,
                                     bf16_eltwise=None):
    B = x.shape[0]
    kp = prepare_kernel_params(params)
    if bf16_eltwise is None:
        bf16_eltwise = _bf16_eltwise_ok()
    eltwise_dtype = jnp.bfloat16 if bf16_eltwise else jnp.float32

    # Sublane-aligned tile size; guarantee >=2 grid blocks whenever the padded
    # batch can be split, so v7x megacore shards the batch across both TCs.
    block_rows = max(8, _round_up(int(block_rows), 8))
    Bp0 = _round_up(B, 8)
    n_blk = _cdiv(Bp0, block_rows)
    if Bp0 >= 16:
        n_blk = max(n_blk, 2)
    TM = _round_up(_cdiv(Bp0, n_blk), 8)
    Bp = TM * n_blk

    # Pack [t, x0, x1, pad] into a single (Bp, 4) f32 input -> one input DMA/step.
    tx = jnp.concatenate(
        [t.astype(jnp.float32)[:, None], x.astype(jnp.float32),
         jnp.zeros((B, 1), jnp.float32)], axis=1)                       # (B, 4)
    if Bp != B:                                # padded rows (t=0, x=0) are benign
        tx = jnp.pad(tx, ((0, Bp - B), (0, 0)))

    weights = (kp["fp"],
               kp["wte1"], kp["bte1"],
               kp["wte2"], kp["bte2"],
               kp["win"], kp["bin"],
               kp["wh1"], kp["bh1"],
               kp["wh2"], kp["bh2"],
               kp["wout"], kp["bout"])

    in_specs = ([pl.BlockSpec((TM, 4), lambda i: (i, 0))]
                + [pl.BlockSpec(w.shape, lambda i: (0, 0)) for w in weights])

    kernel = functools.partial(torsion_mlp_kernel, eltwise_dtype=eltwise_dtype)

    out = pl.pallas_call(
        kernel,
        out_shape=jax.ShapeDtypeStruct((Bp, 2), jnp.float32),
        grid=(n_blk,),
        in_specs=in_specs,
        out_specs=pl.BlockSpec((TM, 2), lambda i: (i, 0)),
        compiler_params=pltpu.CompilerParams(
            dimension_semantics=("parallel",),        # megacore-shard batch tiles
            vmem_limit_bytes=32 * 1024 * 1024,        # safe on v5e/v6e/v7x at TM<=4096
        ),
    )(tx, *weights)
    return out[:B]


# ---------------------------------------------------------------------------
# References
# ---------------------------------------------------------------------------
def reference_forward_mirrored(x, t, params, *, bf16_eltwise=False):
    """Plain-JAX reference mirroring the kernel's numerics exactly."""
    kp = prepare_kernel_params(params)
    f32, bf16 = jnp.float32, jnp.bfloat16
    cdt = bf16 if bf16_eltwise else f32
    t_col = t.astype(f32)[:, None]
    ang = _reduce_angle(t_col * kp["fp"][0:1, :] + kp["fp"][1:2, :])
    emb = jnp.sin(ang).astype(bf16)
    te = jnp.dot(emb, kp["wte1"], preferred_element_type=f32) + kp["bte1"]
    te = _silu(te.astype(cdt))
    te = (jnp.dot(te.astype(bf16), kp["wte2"], preferred_element_type=f32)
          + kp["bte2"]).astype(cdt)
    xf = x.astype(f32)
    h = xf[:, 0:1] * kp["win"][0:1, :] + xf[:, 1:2] * kp["win"][1:2, :] + kp["bin"]
    h = _silu(h.astype(cdt))
    h = _silu((jnp.dot((h + te).astype(bf16), kp["wh1"],
                       preferred_element_type=f32) + kp["bh1"]).astype(cdt))
    h = _silu((jnp.dot((h + te).astype(bf16), kp["wh2"],
                       preferred_element_type=f32) + kp["bh2"]).astype(cdt))
    return (jnp.dot(h.astype(bf16), kp["wout"], preferred_element_type=f32)
            + kp["bout"]).astype(f32)


def reference_forward_f32(x, t, params):
    """Full-precision reference matching the torch module exactly."""
    half = TIME_EMBED_DIM // 2
    scale = math.log(10000.0) / (half - 1)
    freqs = jnp.exp(jnp.arange(half, dtype=jnp.float32) * (-scale))
    emb = t.astype(jnp.float32)[:, None] * freqs[None, :]
    t_emb = jnp.concatenate([jnp.sin(emb), jnp.cos(emb)], axis=1)
    te = jax.nn.silu(t_emb @ params["wte1"] + params["bte1"])
    te = te @ params["wte2"] + params["bte2"]
    h = jax.nn.silu(x @ params["win"] + params["bin"])
    h = jax.nn.silu((h + te) @ params["wh1"] + params["bh1"])
    h = jax.nn.silu((h + te) @ params["wh2"] + params["bh2"])
    return h @ params["wout"] + params["bout"]


if __name__ == "__main__":
    key = jax.random.PRNGKey(0)
    k_param, k_x1, k_t1, k_x2, k_t2 = jax.random.split(key, 5)
    params = init_params(k_param)
    use_bf16 = _bf16_eltwise_ok()

    # Case 1: small batch (single tile)
    x1 = jax.random.normal(k_x1, (8, 2), jnp.float32)       # torsion angles [B, 2]
    t1 = jax.random.randint(k_t1, (8,), 0, 1000)             # integer timesteps [B]
    o1 = jax.block_until_ready(simple_torsion_diffusion_forward(x1, t1, params))
    assert o1.shape == (8, 2)
    r1 = reference_forward_mirrored(x1, t1, params, bf16_eltwise=use_bf16)
    f1 = reference_forward_f32(x1, t1, params)
    assert jnp.allclose(o1, r1, atol=3e-2, rtol=3e-2), "mismatch vs mirrored reference"
    assert jnp.allclose(o1, f1, atol=1e-1, rtol=1e-1), "mismatch vs f32 reference"

    # Case 2: default tiling (B=600 -> 2 parallel tiles of 304 rows, last padded)
    x2 = jax.random.normal(k_x2, (600, 2), jnp.float32)
    t2 = jax.random.randint(k_t2, (600,), 0, 1000)
    o2 = jax.block_until_ready(simple_torsion_diffusion_forward(x2, t2, params))
    assert o2.shape == (600, 2)
    r2 = reference_forward_mirrored(x2, t2, params, bf16_eltwise=use_bf16)
    assert jnp.allclose(o2, r2, atol=3e-2, rtol=3e-2), "mismatch vs reference (2 tiles)"

    # Case 3: explicit small block_rows (3-tile grid, exercises tile clamping)
    o3 = jax.block_until_ready(
        simple_torsion_diffusion_forward(x2, t2, params, block_rows=256))
    assert o3.shape == (600, 2)
    assert jnp.allclose(o3, r2, atol=3e-2, rtol=3e-2), "mismatch vs reference (3 tiles)"

    print("KERNEL_OK")
</pallas_src>

<mosaic_0001>
module attributes {stable_mosaic.version = 11 : i64} {
  func.func @torsion_mlp_kernel(%arg0: i32, %arg1: memref<8x4xf32, #tpu.memory_space<vmem>>, %arg2: memref<2x64xf32, #tpu.memory_space<vmem>>, %arg3: memref<64x128xbf16, #tpu.memory_space<vmem>>, %arg4: memref<1x128xf32, #tpu.memory_space<vmem>>, %arg5: memref<128x128xbf16, #tpu.memory_space<vmem>>, %arg6: memref<1x128xf32, #tpu.memory_space<vmem>>, %arg7: memref<2x128xf32, #tpu.memory_space<vmem>>, %arg8: memref<1x128xf32, #tpu.memory_space<vmem>>, %arg9: memref<128x128xbf16, #tpu.memory_space<vmem>>, %arg10: memref<1x128xf32, #tpu.memory_space<vmem>>, %arg11: memref<128x128xbf16, #tpu.memory_space<vmem>>, %arg12: memref<1x128xf32, #tpu.memory_space<vmem>>, %arg13: memref<128x2xbf16, #tpu.memory_space<vmem>>, %arg14: memref<1x2xf32, #tpu.memory_space<vmem>>, %arg15: memref<8x2xf32, #tpu.memory_space<vmem>>) attributes {dimension_semantics = [#tpu.dimension_semantics<parallel>], iteration_bounds = array<i64: 1>, scalar_prefetch = 0 : i64, scratch_operands = 0 : i64, tpu.core_type = #tpu.core_type<tc>, window_params = [{transform_indices = @transform_0, window_bounds = array<i64: 8, 4>}, {pipeline_mode = #tpu.pipeline_mode<synchronous>, transform_indices = @transform_1, window_bounds = array<i64: 2, 64>}, {pipeline_mode = #tpu.pipeline_mode<synchronous>, transform_indices = @transform_2, window_bounds = array<i64: 64, 128>}, {pipeline_mode = #tpu.pipeline_mode<synchronous>, transform_indices = @transform_3, window_bounds = array<i64: 1, 128>}, {pipeline_mode = #tpu.pipeline_mode<synchronous>, transform_indices = @transform_4, window_bounds = array<i64: 128, 128>}, {pipeline_mode = #tpu.pipeline_mode<synchronous>, transform_indices = @transform_5, window_bounds = array<i64: 1, 128>}, {pipeline_mode = #tpu.pipeline_mode<synchronous>, transform_indices = @transform_6, window_bounds = array<i64: 2, 128>}, {pipeline_mode = #tpu.pipeline_mode<synchronous>, transform_indices = @transform_7, window_bounds = array<i64: 1, 128>}, {pipeline_mode = #tpu.pipeline_mode<synchronous>, transform_indices = @transform_8, window_bounds = array<i64: 128, 128>}, {pipeline_mode = #tpu.pipeline_mode<synchronous>, transform_indices = @transform_9, window_bounds = array<i64: 1, 128>}, {pipeline_mode = #tpu.pipeline_mode<synchronous>, transform_indices = @transform_10, window_bounds = array<i64: 128, 128>}, {pipeline_mode = #tpu.pipeline_mode<synchronous>, transform_indices = @transform_11, window_bounds = array<i64: 1, 128>}, {pipeline_mode = #tpu.pipeline_mode<synchronous>, transform_indices = @transform_12, window_bounds = array<i64: 128, 2>}, {pipeline_mode = #tpu.pipeline_mode<synchronous>, transform_indices = @transform_13, window_bounds = array<i64: 1, 2>}, {transform_indices = @transform_14, window_bounds = array<i64: 8, 2>}]} {
    %c0 = arith.constant 0 : index
    %c0_0 = arith.constant 0 : index
    %0 = vector.load %arg1[%c0, %c0_0] : memref<8x4xf32, #tpu.memory_space<vmem>>, vector<8x1xf32>
    %c0_1 = arith.constant 0 : index
    %c1 = arith.constant 1 : index
    %1 = vector.load %arg1[%c0_1, %c1] : memref<8x4xf32, #tpu.memory_space<vmem>>, vector<8x1xf32>
    %c0_2 = arith.constant 0 : index
    %c2 = arith.constant 2 : index
    %2 = vector.load %arg1[%c0_2, %c2] : memref<8x4xf32, #tpu.memory_space<vmem>>, vector<8x1xf32>
    %c0_3 = arith.constant 0 : index
    %c0_4 = arith.constant 0 : index
    %3 = vector.load %arg2[%c0_3, %c0_4] : memref<2x64xf32, #tpu.memory_space<vmem>>, vector<1x64xf32>
    %4 = vector.broadcast %0 : vector<8x1xf32> to vector<8x64xf32>
    %5 = vector.broadcast %3 : vector<1x64xf32> to vector<8x64xf32>
    %6 = arith.mulf %4, %5 : vector<8x64xf32>
    %c1_5 = arith.constant 1 : index
    %c0_6 = arith.constant 0 : index
    %7 = vector.load %arg2[%c1_5, %c0_6] : memref<2x64xf32, #tpu.memory_space<vmem>>, vector<1x64xf32>
    %8 = vector.broadcast %7 : vector<1x64xf32> to vector<8x64xf32>
    %9 = arith.addf %6, %8 : vector<8x64xf32>
    %cst = arith.constant 6.28318548 : f32
    %10 = vector.broadcast %cst : f32 to vector<8x64xf32>
    %11 = arith.divf %9, %10 : vector<8x64xf32>
    %cst_7 = arith.constant 5.000000e-01 : f32
    %12 = vector.broadcast %cst_7 : f32 to vector<8x64xf32>
    %13 = arith.addf %11, %12 : vector<8x64xf32>
    %14 = math.floor %13 : vector<8x64xf32>
    %cst_8 = arith.constant 6.28318548 : f32
    %15 = vector.broadcast %cst_8 : f32 to vector<8x64xf32>
    %16 = arith.mulf %15, %14 : vector<8x64xf32>
    %17 = arith.subf %9, %16 : vector<8x64xf32>
    %18 = math.sin %17 : vector<8x64xf32>
    %19 = arith.truncf %18 : vector<8x64xf32> to vector<8x64xbf16>
    %c0_9 = arith.constant 0 : index
    %c0_10 = arith.constant 0 : index
    %20 = vector.load %arg3[%c0_9, %c0_10] : memref<64x128xbf16, #tpu.memory_space<vmem>>, vector<64x128xbf16>
    %cst_11 = arith.constant dense<0.000000e+00> : vector<8x128xf32>
    %21 = tpu.matmul %19, %20, %cst_11 {dimension_numbers = #tpu.dot_dimension_numbers<[1], [0], [0], [1], [0, 0, 1, 1], [], []>} : vector<8x64xbf16>, vector<64x128xbf16>, vector<8x128xf32> -> vector<8x128xf32>
    %c0_12 = arith.constant 0 : index
    %c0_13 = arith.constant 0 : index
    %22 = vector.load %arg4[%c0_12, %c0_13] : memref<1x128xf32, #tpu.memory_space<vmem>>, vector<1x128xf32>
    %23 = vector.broadcast %22 : vector<1x128xf32> to vector<8x128xf32>
    %24 = arith.addf %21, %23 : vector<8x128xf32>
    %cst_14 = arith.constant 5.000000e-01 : f32
    %25 = vector.broadcast %cst_14 : f32 to vector<8x128xf32>
    %26 = arith.mulf %25, %24 : vector<8x128xf32>
    %cst_15 = arith.constant 5.000000e-01 : f32
    %27 = vector.broadcast %cst_15 : f32 to vector<8x128xf32>
    %28 = arith.mulf %27, %24 : vector<8x128xf32>
    %29 = math.tanh %28 : vector<8x128xf32>
    %cst_16 = arith.constant 1.000000e+00 : f32
    %30 = vector.broadcast %cst_16 : f32 to vector<8x128xf32>
    %31 = arith.addf %29, %30 : vector<8x128xf32>
    %32 = arith.mulf %26, %31 : vector<8x128xf32>
    %33 = arith.truncf %32 : vector<8x128xf32> to vector<8x128xbf16>
    %c0_17 = arith.constant 0 : index
    %c0_18 = arith.constant 0 : index
    %34 = vector.load %arg5[%c0_17, %c0_18] : memref<128x128xbf16, #tpu.memory_space<vmem>>, vector<128x128xbf16>
    %cst_19 = arith.constant dense<0.000000e+00> : vector<8x128xf32>
    %35 = tpu.matmul %33, %34, %cst_19 {dimension_numbers = #tpu.dot_dimension_numbers<[1], [0], [0], [1], [0, 0, 1, 1], [], []>} : vector<8x128xbf16>, vector<128x128xbf16>, vector<8x128xf32> -> vector<8x128xf32>
    %c0_20 = arith.constant 0 : index
    %c0_21 = arith.constant 0 : index
    %36 = vector.load %arg6[%c0_20, %c0_21] : memref<1x128xf32, #tpu.memory_space<vmem>>, vector<1x128xf32>
    %37 = vector.broadcast %36 : vector<1x128xf32> to vector<8x128xf32>
    %38 = arith.addf %35, %37 : vector<8x128xf32>
    %c0_22 = arith.constant 0 : index
    %c0_23 = arith.constant 0 : index
    %39 = vector.load %arg7[%c0_22, %c0_23] : memref<2x128xf32, #tpu.memory_space<vmem>>, vector<1x128xf32>
    %40 = vector.broadcast %1 : vector<8x1xf32> to vector<8x128xf32>
    %41 = vector.broadcast %39 : vector<1x128xf32> to vector<8x128xf32>
    %42 = arith.mulf %40, %41 : vector<8x128xf32>
    %c1_24 = arith.constant 1 : index
    %c0_25 = arith.constant 0 : index
    %43 = vector.load %arg7[%c1_24, %c0_25] : memref<2x128xf32, #tpu.memory_space<vmem>>, vector<1x128xf32>
    %44 = vector.broadcast %2 : vector<8x1xf32> to vector<8x128xf32>
    %45 = vector.broadcast %43 : vector<1x128xf32> to vector<8x128xf32>
    %46 = arith.mulf %44, %45 : vector<8x128xf32>
    %47 = arith.addf %42, %46 : vector<8x128xf32>
    %c0_26 = arith.constant 0 : index
    %c0_27 = arith.constant 0 : index
    %48 = vector.load %arg8[%c0_26, %c0_27] : memref<1x128xf32, #tpu.memory_space<vmem>>, vector<1x128xf32>
    %49 = vector.broadcast %48 : vector<1x128xf32> to vector<8x128xf32>
    %50 = arith.addf %47, %49 : vector<8x128xf32>
    %cst_28 = arith.constant 5.000000e-01 : f32
    %51 = vector.broadcast %cst_28 : f32 to vector<8x128xf32>
    %52 = arith.mulf %51, %50 : vector<8x128xf32>
    %cst_29 = arith.constant 5.000000e-01 : f32
    %53 = vector.broadcast %cst_29 : f32 to vector<8x128xf32>
    %54 = arith.mulf %53, %50 : vector<8x128xf32>
    %55 = math.tanh %54 : vector<8x128xf32>
    %cst_30 = arith.constant 1.000000e+00 : f32
    %56 = vector.broadcast %cst_30 : f32 to vector<8x128xf32>
    %57 = arith.addf %55, %56 : vector<8x128xf32>
    %58 = arith.mulf %52, %57 : vector<8x128xf32>
    %59 = arith.addf %58, %38 : vector<8x128xf32>
    %60 = arith.truncf %59 : vector<8x128xf32> to vector<8x128xbf16>
    %c0_31 = arith.constant 0 : index
    %c0_32 = arith.constant 0 : index
    %61 = vector.load %arg9[%c0_31, %c0_32] : memref<128x128xbf16, #tpu.memory_space<vmem>>, vector<128x128xbf16>
    %cst_33 = arith.constant dense<0.000000e+00> : vector<8x128xf32>
    %62 = tpu.matmul %60, %61, %cst_33 {dimension_numbers = #tpu.dot_dimension_numbers<[1], [0], [0], [1], [0, 0, 1, 1], [], []>} : vector<8x128xbf16>, vector<128x128xbf16>, vector<8x128xf32> -> vector<8x128xf32>
    %c0_34 = arith.constant 0 : index
    %c0_35 = arith.constant 0 : index
    %63 = vector.load %arg10[%c0_34, %c0_35] : memref<1x128xf32, #tpu.memory_space<vmem>>, vector<1x128xf32>
    %64 = vector.broadcast %63 : vector<1x128xf32> to vector<8x128xf32>
    %65 = arith.addf %62, %64 : vector<8x128xf32>
    %cst_36 = arith.constant 5.000000e-01 : f32
    %66 = vector.broadcast %cst_36 : f32 to vector<8x128xf32>
    %67 = arith.mulf %66, %65 : vector<8x128xf32>
    %cst_37 = arith.constant 5.000000e-01 : f32
    %68 = vector.broadcast %cst_37 : f32 to vector<8x128xf32>
    %69 = arith.mulf %68, %65 : vector<8x128xf32>
    %70 = math.tanh %69 : vector<8x128xf32>
    %cst_38 = arith.constant 1.000000e+00 : f32
    %71 = vector.broadcast %cst_38 : f32 to vector<8x128xf32>
    %72 = arith.addf %70, %71 : vector<8x128xf32>
    %73 = arith.mulf %67, %72 : vector<8x128xf32>
    %74 = arith.addf %73, %38 : vector<8x128xf32>
    %75 = arith.truncf %74 : vector<8x128xf32> to vector<8x128xbf16>
    %c0_39 = arith.constant 0 : index
    %c0_40 = arith.constant 0 : index
    %76 = vector.load %arg11[%c0_39, %c0_40] : memref<128x128xbf16, #tpu.memory_space<vmem>>, vector<128x128xbf16>
    %cst_41 = arith.constant dense<0.000000e+00> : vector<8x128xf32>
    %77 = tpu.matmul %75, %76, %cst_41 {dimension_numbers = #tpu.dot_dimension_numbers<[1], [0], [0], [1], [0, 0, 1, 1], [], []>} : vector<8x128xbf16>, vector<128x128xbf16>, vector<8x128xf32> -> vector<8x128xf32>
    %c0_42 = arith.constant 0 : index
    %c0_43 = arith.constant 0 : index
    %78 = vector.load %arg12[%c0_42, %c0_43] : memref<1x128xf32, #tpu.memory_space<vmem>>, vector<1x128xf32>
    %79 = vector.broadcast %78 : vector<1x128xf32> to vector<8x128xf32>
    %80 = arith.addf %77, %79 : vector<8x128xf32>
    %cst_44 = arith.constant 5.000000e-01 : f32
    %81 = vector.broadcast %cst_44 : f32 to vector<8x128xf32>
    %82 = arith.mulf %81, %80 : vector<8x128xf32>
    %cst_45 = arith.constant 5.000000e-01 : f32
    %83 = vector.broadcast %cst_45 : f32 to vector<8x128xf32>
    %84 = arith.mulf %83, %80 : vector<8x128xf32>
    %85 = math.tanh %84 : vector<8x128xf32>
    %cst_46 = arith.constant 1.000000e+00 : f32
    %86 = vector.broadcast %cst_46 : f32 to vector<8x128xf32>
    %87 = arith.addf %85, %86 : vector<8x128xf32>
    %88 = arith.mulf %82, %87 : vector<8x128xf32>
    %89 = arith.truncf %88 : vector<8x128xf32> to vector<8x128xbf16>
    %c0_47 = arith.constant 0 : index
    %c0_48 = arith.constant 0 : index
    %90 = vector.load %arg13[%c0_47, %c0_48] : memref<128x2xbf16, #tpu.memory_space<vmem>>, vector<128x2xbf16>
    %cst_49 = arith.constant dense<0.000000e+00> : vector<8x2xf32>
    %91 = tpu.matmul %89, %90, %cst_49 {dimension_numbers = #tpu.dot_dimension_numbers<[1], [0], [0], [1], [0, 0, 1, 1], [], []>} : vector<8x128xbf16>, vector<128x2xbf16>, vector<8x2xf32> -> vector<8x2xf32>
    %c0_50 = arith.constant 0 : index
    %c0_51 = arith.constant 0 : index
    %92 = vector.load %arg14[%c0_50, %c0_51] : memref<1x2xf32, #tpu.memory_space<vmem>>, vector<1x2xf32>
    %93 = vector.broadcast %92 : vector<1x2xf32> to vector<8x2xf32>
    %94 = arith.addf %91, %93 : vector<8x2xf32>
    %c0_52 = arith.constant 0 : index
    %c0_53 = arith.constant 0 : index
    %95 = vector.load %arg15[%c0_52, %c0_53] : memref<8x2xf32, #tpu.memory_space<vmem>>, vector<8x2xf32>
    tpu.vector_store %arg15[%c0_52, %c0_53], %94 {strides = array<i32>} : memref<8x2xf32, #tpu.memory_space<vmem>>, vector<8x2xf32>,
    return
  }
  func.func @transform_0(%arg0: i32) -> (i32, i32) {
    %c0_i32 = arith.constant 0 : i32
    %c0_i32_0 = arith.constant 0 : i32
    return %arg0, %c0_i32 : i32, i32
  }
  func.func @transform_1(%arg0: i32) -> (i32, i32) {
    %c0_i32 = arith.constant 0 : i32
    %c0_i32_0 = arith.constant 0 : i32
    %c0_i32_1 = arith.constant 0 : i32
    return %c0_i32, %c0_i32_0 : i32, i32
  }
  func.func @transform_2(%arg0: i32) -> (i32, i32) {
    %c0_i32 = arith.constant 0 : i32
    %c0_i32_0 = arith.constant 0 : i32
    %c0_i32_1 = arith.constant 0 : i32
    return %c0_i32, %c0_i32_0 : i32, i32
  }
  func.func @transform_3(%arg0: i32) -> (i32, i32) {
    %c0_i32 = arith.constant 0 : i32
    %c0_i32_0 = arith.constant 0 : i32
    %c0_i32_1 = arith.constant 0 : i32
    return %c0_i32, %c0_i32_0 : i32, i32
  }
  func.func @transform_4(%arg0: i32) -> (i32, i32) {
    %c0_i32 = arith.constant 0 : i32
    %c0_i32_0 = arith.constant 0 : i32
    %c0_i32_1 = arith.constant 0 : i32
    return %c0_i32, %c0_i32_0 : i32, i32
  }
  func.func @transform_5(%arg0: i32) -> (i32, i32) {
    %c0_i32 = arith.constant 0 : i32
    %c0_i32_0 = arith.constant 0 : i32
    %c0_i32_1 = arith.constant 0 : i32
    return %c0_i32, %c0_i32_0 : i32, i32
  }
  func.func @transform_6(%arg0: i32) -> (i32, i32) {
    %c0_i32 = arith.constant 0 : i32
    %c0_i32_0 = arith.constant 0 : i32
    %c0_i32_1 = arith.constant 0 : i32
    return %c0_i32, %c0_i32_0 : i32, i32
  }
  func.func @transform_7(%arg0: i32) -> (i32, i32) {
    %c0_i32 = arith.constant 0 : i32
    %c0_i32_0 = arith.constant 0 : i32
    %c0_i32_1 = arith.constant 0 : i32
    return %c0_i32, %c0_i32_0 : i32, i32
  }
  func.func @transform_8(%arg0: i32) -> (i32, i32) {
    %c0_i32 = arith.constant 0 : i32
    %c0_i32_0 = arith.constant 0 : i32
    %c0_i32_1 = arith.constant 0 : i32
    return %c0_i32, %c0_i32_0 : i32, i32
  }
  func.func @transform_9(%arg0: i32) -> (i32, i32) {
    %c0_i32 = arith.constant 0 : i32
    %c0_i32_0 = arith.constant 0 : i32
    %c0_i32_1 = arith.constant 0 : i32
    return %c0_i32, %c0_i32_0 : i32, i32
  }
  func.func @transform_10(%arg0: i32) -> (i32, i32) {
    %c0_i32 = arith.constant 0 : i32
    %c0_i32_0 = arith.constant 0 : i32
    %c0_i32_1 = arith.constant 0 : i32
    return %c0_i32, %c0_i32_0 : i32, i32
  }
  func.func @transform_11(%arg0: i32) -> (i32, i32) {
    %c0_i32 = arith.constant 0 : i32
    %c0_i32_0 = arith.constant 0 : i32
    %c0_i32_1 = arith.constant 0 : i32
    return %c0_i32, %c0_i32_0 : i32, i32
  }
  func.func @transform_12(%arg0: i32) -> (i32, i32) {
    %c0_i32 = arith.constant 0 : i32
    %c0_i32_0 = arith.constant 0 : i32
    %c0_i32_1 = arith.constant 0 : i32
    return %c0_i32, %c0_i32_0 : i32, i32
  }
  func.func @transform_13(%arg0: i32) -> (i32, i32) {
    %c0_i32 = arith.constant 0 : i32
    %c0_i32_0 = arith.constant 0 : i32
    %c0_i32_1 = arith.constant 0 : i32
    return %c0_i32, %c0_i32_0 : i32, i32
  }
  func.func @transform_14(%arg0: i32) -> (i32, i32) {
    %c0_i32 = arith.constant 0 : i32
    %c0_i32_0 = arith.constant 0 : i32
    return %arg0, %c0_i32 : i32, i32
  }
}

</mosaic_0001>

<bundles_post_ra>
// kernel: tpu_custom_call.1
= control target key start
LH: loop header
LB: loop body
LE: loop exit
PB: predicated region body
PF: predicated region fallthrough
CT: control target
= control target key end

     0   :  { %19 = vsyncpa [#allocation3], 0  ;;  %s1429_s0 = inlined_call_operand.vmem [shape: f32[8,4], index: 0, kind: input, shape index: {}]   ;;  %s1430_s1 = inlined_call_operand.vmem [shape: f32[2,64], index: 1, kind: input, shape index: {}]   ;;  %s1431_s2 = inlined_call_operand.hbm [shape: bf16[64,128], index: 2, kind: input, shape index: {}]   ;;  %s1432_s3 = inlined_call_operand.vmem [shape: f32[1,128], index: 3, kind: input, shape index: {}]   ;;  %s1433_s4 = inlined_call_operand.vmem [shape: bf16[128,128], index: 4, kind: input, shape index: {}]   ;;  %s1434_s5 = inlined_call_operand.vmem [shape: f32[1,128], index: 5, kind: input, shape index: {}]   ;;  %s1435_s6 = inlined_call_operand.vmem [shape: f32[2,128], index: 6, kind: input, shape index: {}]   ;;  %s1436_s7 = inlined_call_operand.vmem [shape: f32[1,128], index: 7, kind: input, shape index: {}]   ;;  %s1437_s8 = inlined_call_operand.hbm [shape: bf16[128,128], index: 8, kind: input, shape index: {}]   ;;  %s1438_s9 = inlined_call_operand.vmem [shape: f32[1,128], index: 9, kind: input, shape index: {}]   ;;  %s1439_s10 = inlined_call_operand.hbm [shape: bf16[128,128], index: 10, kind: input, shape index: {}]   ;;  %s1440_s11 = inlined_call_operand.vmem [shape: f32[1,128], index: 11, kind: input, shape index: {}]   ;;  %s1441_s12 = inlined_call_operand.vmem [shape: bf16[128,2], index: 12, kind: input, shape index: {}]   ;;  %s1442_s13 = inlined_call_operand.vmem [shape: f32[1,2], index: 13, kind: input, shape index: {}]   ;;  %s1443_s14 = inlined_call_operand.vmem [shape: f32[8,2], index: 14, kind: output, shape index: {}]  }
   0x1   :  { %20 = vsyncpa [#allocation5], 0  ;;  %s1130_s29 = smov [#allocation4]   ;;  %s1131_s15 = smov [#allocation2]  }
   0x2   :  { %s52_s30 = sshll.u32 %s1130_s29, 4  ;;  %s30_s16 = sshll.u32 %s1131_s15, 4  ;;  %s53_s30 = int_to_ptr.vmem [resolvable:$true] %s52_s30  ;;  %s1221_s16 = int_to_ptr.vmem [resolvable:$true] %s30_s16 }
   0x3   :  { %s1060_s19 = scalar_lea.hbm %s1437_s8, 1024 }
   0x4   :  { %p1061_p0 = scmp.ne.s32.totalorder %s1437_s8, %s1060_s19  ;;  %p1064_p1 = scmp.lt.u32.totalorder %s1060_s19, %s1437_s8 }
   0x6   :  { %p1066_p2 = pnand %p1064_p1, %p1061_p0 }
   0x8   :  { %1069 = shalt.err (!%p1066_p2)
}
   0x9   :  { %s1070_s24 = scalar_lea.vmem %s53_s30, 1024  ;;  %p1075_p4 = scmp.lt.s32.totalorder %s53_s30, %s53_s30 }
   0xa   :  { %p1071_p3 = scmp.ne.s32.totalorder %s53_s30, %s1070_s24  ;;  %p1076_p5 = scmp.lt.s32.totalorder %s1070_s24, %s1070_s24 }
   0xc   :  { %p1077_p6 = por %p1076_p5, %p1075_p4 }
   0xe   :  { %p1078_p7 = pnand %p1077_p6, %p1071_p3 }
  0x10   :  { %1081 = shalt.err (!%p1078_p7)
}
  0x11   :  { %s1132_s25 = smov 64   ;;  %s1133_s26 = smov 4  }
  0x12   :  { %58 = dma.hbm_to_vmem [thread:$0]  %s1437_s8, 1024, %s53_s30, [#allocation5], %s1132_s25, %s1132_s25, %s1133_s26  }
  0x13   :  { %s1082_s17 = scalar_lea.hbm %s1431_s2, 512 }
  0x14   :  { %p1083_p8 = scmp.ne.s32.totalorder %s1431_s2, %s1082_s17  ;;  %p1086_p9 = scmp.lt.u32.totalorder %s1082_s17, %s1431_s2 }
  0x16   :  { %p1088_p10 = pnand %p1086_p9, %p1083_p8 }
  0x18   :  { %1091 = shalt.err (!%p1088_p10)
}
  0x19   :  { %s1092_s22 = scalar_lea.vmem %s1221_s16, 512  ;;  %p1097_p12 = scmp.lt.s32.totalorder %s1221_s16, %s1221_s16 }
  0x1a   :  { %p1093_p11 = scmp.ne.s32.totalorder %s1221_s16, %s1092_s22  ;;  %p1098_p13 = scmp.lt.s32.totalorder %s1092_s22, %s1092_s22 }
  0x1c   :  { %p1099_p0 = por %p1098_p13, %p1097_p12 }
  0x1e   :  { %p1100_p1 = pnand %p1099_p0, %p1093_p11 }
  0x20   :  { %1103 = shalt.err (!%p1100_p1)
}
  0x21   :  { %36 = dma.hbm_to_vmem [thread:$0]  %s1431_s2, 512, %s1221_s16, [#allocation3], %s1132_s25, %s1132_s25, %s1133_s26  }
  0x22   :  { %s1134_s23 = smov [#allocation6]   ;;  %s1104_s29 = scalar_lea.hbm %s1439_s10, 1024 }
  0x23   :  { %s66_s24 = sshll.u32 %s1134_s23, 4  ;;  %p1105_p2 = scmp.ne.s32.totalorder %s1439_s10, %s1104_s29  ;;  %s67_s24 = int_to_ptr.vmem [resolvable:$true] %s66_s24 }
  0x24   :  { %p1108_p3 = scmp.lt.u32.totalorder %s1104_s29, %s1439_s10 }
  0x26   :  { %p1110_p4 = pnand %p1108_p3, %p1105_p2 }
  0x28   :  { %1113 = shalt.err (!%p1110_p4)
}
  0x29   :  { %s1114_s20 = scalar_lea.vmem %s67_s24, 1024  ;;  %p1119_p6 = scmp.lt.s32.totalorder %s67_s24, %s67_s24 }
  0x2a   :  { %p1115_p5 = scmp.ne.s32.totalorder %s67_s24, %s1114_s20  ;;  %p1120_p7 = scmp.lt.s32.totalorder %s1114_s20, %s1114_s20 }
  0x2c   :  { %p1121_p8 = por %p1120_p7, %p1119_p6 }
  0x2e   :  { %p1122_p9 = pnand %p1121_p8, %p1115_p5 }
  0x30   :  { %1125 = shalt.err (!%p1122_p9)
}
  0x31   :  { %72 = dma.hbm_to_vmem [thread:$0]  %s1439_s10, 1024, %s67_s24, [#allocation5], %s1132_s25, %s1132_s25, %s1133_s26  }
  0x32   :  { %1126 = dma.done.wait [#allocation3], 512  }
  0x33   :  { %1127 = vsyncadd [#allocation3], 4294966784 }
  0x34   :  { %1128 = dma.done.wait [#allocation5], 2048  }
  0x35   :  { %1129 = vsyncadd [#allocation5], 4294965248  ;;  %v1135_v0 = vmov 0   ;;  %v1276_v1 = vld [vmem:[%s1429_s0] sm:$0xff]  ;;  %v1136_v3 = vmov 0.0   ;;  %vm1137_vm0 = vmmov 0  }
  0x36   :  { %1008 = vset.pattern.permute.xlu0 %v1135_v0  ;;  %v1012_v2 = vld [vmem:[#allocation2] sm:$0xff]   ;;  %896 = vmatprep.subr.bf16.mxu0 %v1136_v3  ;;  %v1013_v4 = vld [vmem:[#allocation2 + $0x8] sm:$0xff]   ;;  %v1014_v5 = vld [vmem:[#allocation2 + $0x10] sm:$0xff]   ;;  %v1138_v30 = vmov 683565275   ;;  %vm257_vm14 = vcmask 523264  }
  0x37   :  { %93 = vperm.xlu0 %1008, %v1276_v1   ;;  %904 = vmatprep.mubr.msk.bf16.mxu0 %vm1137_vm0, %v1136_v3  ;;  %v1015_v6 = vld [vmem:[#allocation2 + $0x18] sm:$0xff]   ;;  %v1016_v7 = vld [vmem:[%s1433_s4] sm:$0xff]   ;;  %v1017_v8 = vld [vmem:[%s1433_s4 + $0x8] sm:$0xff]   ;;  %v1139_v32 = vmov 2475754826   ;;  %vm796_vm15 = vcmask 15360  }
  0x38   :  { %897 = vmatpush3.bf16.msra.mxu0 %v1012_v2  ;;  %908 = vmatprep.subr.bf16.mxu1 %v1136_v3  ;;  %v1018_v9 = vld [vmem:[%s1433_s4 + $0x10] sm:$0xff]   ;;  %v804_v10 = vld [vmem:[%s1430_s1] ss:$0 sm:$0xff]  ;;  %v805_v11 = vld [vmem:[%s1430_s1 + $0x1] ss:$0 sm:$0xff] }
  0x39   :  { %898 = vmatprep.subr.bf16.mxu0 %v1136_v3  ;;  %924 = vmatprep.mubr.msk.bf16.mxu1 %vm1137_vm0, %v1136_v3  ;;  %v1140_v35 = vmov 2131351028   ;;  %v1141_v38 = vmov 2102212464   ;;  %v1142_v41 = vmov 920167782  }
  0x3a   :  { %909 = vmatpush3.bf16.msra.mxu1 %v1016_v7  ;;  %v1143_v44 = vmov 1326507024  }
  0x3b   :  { %910 = vmatprep.subr.bf16.mxu1 %v1136_v3 }
  0x3c   :  { %899 = vmatpush3.bf16.msra.mxu0 %v1013_v4 }
  0x3d   :  { %900 = vmatprep.subr.bf16.mxu0 %v1136_v3 }
  0x3e   :  { %911 = vmatpush3.bf16.msra.mxu1 %v1017_v8 }
  0x3f   :  { %912 = vmatprep.subr.bf16.mxu1 %v1136_v3 }
  0x40   :  { %901 = vmatpush3.bf16.msra.mxu0 %v1014_v5 }
  0x41   :  { %902 = vmatprep.subr.bf16.mxu0 %v1136_v3 }
  0x42   :  { %913 = vmatpush3.bf16.msra.mxu1 %v1018_v9 }
  0x43   :  { %914 = vmatprep.subr.bf16.mxu1 %v1136_v3 }
  0x44   :  { %903 = vmatpush3.bf16.msra.mxu0 %v1015_v6 }
  0x45   :  { %928 = vmatprep.subr.bf16.mxu0 %v1136_v3 }
  0xb6   :  { %v94_v12 = vpop.permute.xlu0 %93 }
  0xb7   :  { %v100_v13 = vmul.f32 %v804_v10, %v94_v12 }
  0xb9   :  { %v106_v14 = vadd.f32 %v805_v11, %v100_v13 }
  0xbb   :  { %v108_v15 = vmul.f32 0.15915494, %v106_v14 }
  0xbd   :  { %v109_v16 = vadd.f32 0.5, %v108_v15 }
  0xbf   :  { %v110_v17 = vfloor.f32 %v109_v16 }
  0xc1   :  { %v111_v18 = vmul.f32 6.2831855, %v110_v17 }
  0xc3   :  { %v1307_v19 = vsub.f32 %v106_v14, %v111_v18 }
  0xc5   :  { %v116_v20 = vand.u32 2139095040, %v1307_v19  ;;  %v113_v24 = vand.u32 2147483647, %v1307_v19  ;;  %vm115_vm8 = vcmp.lt.s32.totalorder %v1307_v19, 0  ;;  %vm205_vm13 = vweird.f32 %v1307_v19 }
  0xc7   :  { %v117_v21 = vshrl.u32 %v116_v20, 23  ;;  %v120_v27 = vand.u32 8388607, %v113_v24  ;;  %vm114_vm9 = vcmp.le.f32.partialorder %v113_v24, 0.7853982 }
  0xc9   :  { %v806_v22 = vadd.s32 4294967169, %v117_v21  ;;  %v121_v46 = vor.u32 8388608, %v120_v27 }
  0xcb   :  { %v123_v23 = vadd.s32 1, %v806_v22  ;;  %v161_v60 = vshll.u32 %v121_v46, 8 }
  0xcd   :  { %vm124_vm1 = vcmp.gt.s32.totalorder %v123_v23, 0 }
  0xce   :  { %v125_v25 = vsel %vm124_vm1, %v123_v23, 0 }
  0xcf   :  { %v127_v26 = vand.u32 31, %v125_v25  ;;  %v126_v29 = vshrl.u32 %v125_v25, 5 }
  0xd1   :  { %v128_v28 = vsub.s32 32, %v127_v26  ;;  %v130_v31 = vshll.u32 %v1138_v30, %v127_v26  ;;  %v133_v33 = vshll.u32 %v1139_v32, %v127_v26  ;;  %v136_v37 = vshll.u32 %v1140_v35, %v127_v26 }
  0xd2   :  { %v139_v40 = vshll.u32 %v1141_v38, %v127_v26  ;;  %v142_v43 = vshll.u32 %v1142_v41, %v127_v26  ;;  %vm145_vm2 = vcmp.lt.s32.totalorder %v126_v29, 1  ;;  %vm148_vm3 = vcmp.lt.s32.totalorder %v126_v29, 4 }
  0xd3   :  { %v131_v34 = vshrl.u32 %v1139_v32, %v128_v28  ;;  %v134_v36 = vshrl.u32 %v1140_v35, %v128_v28  ;;  %v137_v39 = vshrl.u32 %v1141_v38, %v128_v28  ;;  %v140_v42 = vshrl.u32 %v1142_v41, %v128_v28 }
  0xd4   :  { %v143_v45 = vshrl.u32 %v1143_v44, %v128_v28  ;;  %v129_v55 = vshrl.u32 %v1138_v30, %v128_v28  ;;  %vm147_vm4 = vcmp.lt.s32.totalorder %v126_v29, 3  ;;  %vm146_vm5 = vcmp.lt.s32.totalorder %v126_v29, 2 }
  0xd5   :  { %v132_v47 = vor.u32 %v131_v34, %v130_v31  ;;  %v135_v48 = vor.u32 %v134_v36, %v133_v33  ;;  %v138_v49 = vor.u32 %v137_v39, %v136_v37  ;;  %v141_v50 = vor.u32 %v140_v42, %v139_v40 }
  0xd6   :  { %v144_v51 = vor.u32 %v143_v45, %v142_v43 }
  0xd7   :  { %v150_v52 = vsel %vm148_vm3, %v138_v49, 2102212464  ;;  %v153_v53 = vsel %vm145_vm2, %v132_v47, %v135_v48  ;;  %v157_v54 = vsel %vm145_vm2, %v135_v48, %v138_v49  ;;  %v154_v56 = vsel %vm148_vm3, %v141_v50, 920167782 }
  0xd8   :  { %v158_v57 = vsel %vm148_vm3, %v144_v51, 1326507024  ;;  %v155_v58 = vsel %vm147_vm4, %v138_v49, %v154_v56  ;;  %v149_v61 = vsel %vm145_vm2, %v129_v55, %v132_v47  ;;  %v151_v62 = vsel %vm147_vm4, %v135_v48, %v150_v52  ;;  %v1019_v51 = vld [vmem:[%s1433_s4 + $0x18] sm:$0xff]   ;;  %v1020_v52 = vld [vmem:[%s1433_s4 + $0x20] sm:$0xff]  }
  0xd9   :  { %v159_v59 = vsel %vm147_vm4, %v141_v50, %v158_v57  ;;  %v156_v63 = vsel %vm146_vm5, %v153_v53, %v155_v58  ;;  %v152_v7 = vsel %vm146_vm5, %v149_v61, %v151_v62  ;;  %915 = vmatpush3.bf16.msra.mxu1 %v1019_v51  ;;  %v1022_v53 = vld [vmem:[%s1433_s4 + $0x30] sm:$0xff]   ;;  %v1144_v55 = vmov 2   ;;  %v1024_v57 = vld [vmem:[#allocation4] sm:$0xff]   ;;  %v1025_v58 = vld [vmem:[#allocation4 + $0x8] sm:$0xff]  }
  0xda   :  { %v160_v0 = vsel %vm146_vm5, %v157_v54, %v159_v59  ;;  %v1316_v5 = vmul.u32.u64.low %v161_v60, %v156_v63  ;;  %v1317_v6 = vmul.u32.u64.high %v161_v60, %v156_v63, %v1316_v5  ;;  %v168_v9 = vmul.u32 %v161_v60, %v152_v7  ;;  %916 = vmatprep.subr.bf16.mxu1 %v1136_v3  ;;  %v1023_v54 = vld [vmem:[%s1433_s4 + $0x38] sm:$0xff]   ;;  %1010 = vset.pattern.permute.xlu1 %v1144_v55  ;;  %v1026_v59 = vld [vmem:[#allocation4 + $0x10] sm:$0xff]   ;;  %v1028_v61 = vld [vmem:[#allocation4 + $0x20] sm:$0xff]  }
  0xdb   :  { %v1313_v2 = vmul.u32.u64.low %v161_v60, %v160_v0  ;;  %v1314_v4 = vmul.u32.u64.high %v161_v60, %v160_v0, %v1313_v2  ;;  %v1145_v56 = vmov 1   ;;  %429 = vperm.xlu1 %1010, %v1276_v1   ;;  %v1027_v60 = vld [vmem:[#allocation4 + $0x18] sm:$0xff]   ;;  %v810_v62 = vld [vmem:[%s1432_s3] ss:$0 sm:$0xff] }
  0xdc   :  { %v171_v8 = vadd.s32 1, %v1317_v6  ;;  %1009 = vset.pattern.permute.xlu0 %v1145_v56 }
  0xdd   :  { %vm170_vm6 = vc.u32 %v1314_v4, %v1316_v5  ;;  %v169_v22 = vadd.s32 %v1316_v5, %v1314_v4  ;;  %917 = vmatpush3.bf16.msra.mxu1 %v1020_v52  ;;  %419 = vperm.xlu0 %1009, %v1276_v1   ;;  %v1029_v1 = vld [vmem:[#allocation4 + $0x28] sm:$0xff]  }
  0xde   :  { %v172_v10 = vsel %vm170_vm6, %v171_v8, %v1317_v6  ;;  %918 = vmatprep.subr.bf16.mxu1 %v1136_v3 }
  0xdf   :  { %v173_v11 = vadd.s32 %v172_v10, %v168_v9 }
  0xe1   :  { %v174_v12 = vadd.s32 536870912, %v173_v11  ;;  %1011 = vset.pattern.permute.xlu0 %v1144_v55 }
  0xe3   :  { %v175_v13 = vshrl.u32 %v174_v12, 30  ;;  %v1031_v12 = vld [vmem:[#allocation4 + $0x38] sm:$0xff]  }
  0xe5   :  { %v176_v14 = vshll.u32 %v175_v13, 30  ;;  %v199_v35 = vsub.s32 4, %v175_v13 }
  0xe7   :  { %v177_v15 = vsub.s32 %v173_v11, %v176_v14  ;;  %v200_v38 = vsel %vm115_vm8, %v199_v35, %v175_v13  ;;  %v1030_v11 = vld [vmem:[#allocation4 + $0x30] sm:$0xff]   ;;  %v1032_v13 = vld [vmem:[#allocation6] sm:$0xff]   ;;  %v1033_v14 = vld [vmem:[#allocation6 + $0x8] sm:$0xff]  }
  0xe8   :  { %v202_v40 = vsel %vm114_vm9, 0, %v200_v38  ;;  %v1034_v38 = vld [vmem:[#allocation6 + $0x10] sm:$0xff]  }
  0xe9   :  { %v179_v16 = vsub.s32 0, %v177_v15  ;;  %v206_v41 = vadd.s32 3, %v202_v40  ;;  %v1036_v40 = vld [vmem:[#allocation6 + $0x20] sm:$0xff]  }
  0xeb   :  { %v807_v17 = vmin.u32 %v179_v16, %v177_v15  ;;  %v207_v42 = vand.u32 3, %v206_v41  ;;  %v1037_v41 = vld [vmem:[#allocation6 + $0x28] sm:$0xff]  }
  0xed   :  { %v181_v18 = vclz %v807_v17  ;;  %vm212_vm10 = vcmp.eq.s32.totalorder %v207_v42, 2  ;;  %vm209_vm11 = vcmp.eq.s32.totalorder %v207_v42, 0  ;;  %vm208_vm12 = vcmp.lt.s32.totalorder %v207_v42, 2  ;;  %v825_v17 = vld [vmem:[%s1435_s6] ss:$0 sm:$0xff]  ;;  %v1038_v42 = vld [vmem:[#allocation6 + $0x30] sm:$0xff]  }
  0xef   :  { %v808_v20 = vadd.s32 4294967294, %v181_v18 }
  0xf1   :  { %vm809_vm7 = vcmp.lt.s32.totalorder %v808_v20, 0 }
  0xf2   :  { %v184_v21 = vsel %vm809_vm7, 0, %v808_v20 }
  0xf3   :  { %v185_v23 = vsub.s32 32, %v184_v21  ;;  %v189_v25 = vsub.s32 4294967266, %v184_v21  ;;  %v186_v26 = vshll.u32 %v177_v15, %v184_v21  ;;  %v826_v15 = vld [vmem:[%s1435_s6 + $0x1] ss:$0 sm:$0xff] }
  0xf5   :  { %v187_v27 = vshrl.u32 %v169_v22, %v185_v23  ;;  %v190_v28 = vadd.s32 127, %v189_v25  ;;  %v827_v23 = vld [vmem:[%s1436_s7] ss:$0 sm:$0xff] }
  0xf7   :  { %v188_v29 = vor.u32 %v187_v27, %v186_v26  ;;  %v191_v30 = vshll.u32 %v190_v28, 23 }
  0xf9   :  { %v192_v31 = vor.u32 4788187, %v191_v30  ;;  %v195_v33 = vcvt.s32.f32 %v188_v29  ;;  %v816_v29 = vld [vmem:[%s1434_s5] ss:$0 sm:$0xff] }
  0xfb   :  { %v193_v32 = vand.u32 2147483647, %v192_v31 }
  0xfd   :  { %v196_v34 = vmul.f32 %v195_v33, %v193_v32 }
  0xff   :  { %v197_v36 = vxor.u32 2147483648, %v196_v34 }
 0x101   :  { %v198_v37 = vsel %vm115_vm8, %v197_v36, %v196_v34 }
 0x102   :  { %v201_v39 = vsel %vm114_vm9, %v1307_v19, %v198_v37  ;;  %v1021_v19 = vld [vmem:[%s1433_s4 + $0x28] sm:$0xff]  }
 0x103   :  { %1048 = vcosq.f32 %v201_v39  ;;  %919 = vmatpush3.bf16.msra.mxu1 %v1021_v19 }
 0x104   :  { %1050 = vsinq.f32 %v201_v39  ;;  %920 = vmatprep.subr.bf16.mxu1 %v1136_v3  ;;  %v1035_v39 = vld [vmem:[#allocation6 + $0x18] sm:$0xff]  }
 0x107   :  { %921 = vmatpush3.bf16.msra.mxu1 %v1022_v53 }
 0x108   :  { %922 = vmatprep.subr.bf16.mxu1 %v1136_v3 }
 0x10b   :  { %923 = vmatpush3.bf16.msra.mxu1 %v1023_v54 }
 0x10c   :  { %948 = vmatprep.subr.bf16.mxu1 %v1136_v3 }
 0x10d   :  { %v1049_v43 = vpop.eup %1048 }
 0x10e   :  { %v1051_v44 = vpop.eup %1050  ;;  %v213_v45 = vxor.u32 2147483648, %v1049_v43 }
 0x10f   :  { %v210_v46 = vxor.u32 2147483648, %v1051_v44 }
 0x110   :  { %v214_v47 = vsel %vm212_vm10, %v213_v45, %v1051_v44  ;;  %v1040_v44 = vld [vmem:[%s1441_s12] sm:$0xff]   ;;  %v1041_v45 = vld [vmem:[%s1441_s12 + $0x8] sm:$0xff]  }
 0x111   :  { %v211_v48 = vsel %vm209_vm11, %v1049_v43, %v210_v46  ;;  %v1039_v43 = vld [vmem:[#allocation6 + $0x38] sm:$0xff]   ;;  %v1042_v46 = vld [vmem:[%s1441_s12 + $0x10] sm:$0xff]  }
 0x112   :  { %v215_v24 = vsel %vm208_vm12, %v211_v48, %v214_v47  ;;  %v828_v47 = vld [vmem:[%s1438_s9] ss:$0 sm:$0xff] }
 0x113   :  { %v216_v49 = vsel %vm205_vm13, nan, %v215_v24 }
 0x114   :  { %v217_v50 = vpack.c.bf16 %v216_v49, %v216_v49 }
 0x116   :  { %905 = vmatmul.mubr.msk.bf16.vlgmr.msra.gmra.mrb[0].mxu0 %vm257_vm14, %v217_v50 }
 0x117   :  { %944 = vmatprep.mubr.msk.bf16.mxu0 %vm1137_vm0, %v1136_v3  ;;  %929 = vmatpush3.bf16.msra.mxu0 %v1024_v57  ;;  %v1043_v57 = vld [vmem:[%s1441_s12 + $0x18] sm:$0xff]  }
 0x118   :  { %930 = vmatprep.subr.bf16.mxu0 %v1136_v3 }
 0x11b   :  { %931 = vmatpush3.bf16.msra.mxu0 %v1025_v58  ;;  %v1044_v58 = vld [vmem:[%s1441_s12 + $0x20] sm:$0xff]  }
 0x11c   :  { %932 = vmatprep.subr.bf16.mxu0 %v1136_v3 }
 0x11f   :  { %933 = vmatpush3.bf16.msra.mxu0 %v1026_v59  ;;  %v1045_v59 = vld [vmem:[%s1441_s12 + $0x28] sm:$0xff]  }
 0x120   :  { %934 = vmatprep.subr.bf16.mxu0 %v1136_v3 }
 0x123   :  { %935 = vmatpush3.bf16.msra.mxu0 %v1027_v60  ;;  %v1046_v60 = vld [vmem:[%s1441_s12 + $0x30] sm:$0xff]  }
 0x124   :  { %936 = vmatprep.subr.bf16.mxu0 %v1136_v3 }
 0x127   :  { %937 = vmatpush3.bf16.msra.mxu0 %v1028_v61  ;;  %v1047_v61 = vld [vmem:[%s1441_s12 + $0x38] sm:$0xff]  }
 0x128   :  { %938 = vmatprep.subr.bf16.mxu0 %v1136_v3 }
 0x12b   :  { %939 = vmatpush3.bf16.msra.mxu0 %v1029_v1  ;;  %v837_v1 = vld [vmem:[%s1440_s11] ss:$0 sm:$0xff] }
 0x12c   :  { %940 = vmatprep.subr.bf16.mxu0 %v1136_v3 }
 0x12f   :  { %941 = vmatpush3.bf16.msra.mxu0 %v1030_v11 }
 0x130   :  { %942 = vmatprep.subr.bf16.mxu0 %v1136_v3 }
 0x133   :  { %943 = vmatpush3.bf16.msra.mxu0 %v1031_v12 }
 0x134   :  { %968 = vmatprep.subr.bf16.mxu0 %v1136_v3 }
 0x15a   :  { %v430_v16 = vpop.permute.xlu1 %429 }
 0x15b   :  { %v436_v20 = vmul.f32 %v826_v15, %v430_v16 }
 0x15c   :  { %v420_v18 = vpop.permute.xlu0 %419 }
 0x15d   :  { %v426_v21 = vmul.f32 %v825_v17, %v420_v18 }
 0x15f   :  { %v437_v22 = vadd.f32 %v436_v20, %v426_v21 }
 0x161   :  { %v445_v25 = vadd.f32 %v827_v23, %v437_v22 }
 0x163   :  { %v446_v26 = vmul.f32 0.5, %v445_v25 }
 0x1e9   :  { %v295_v63 = vpop.f32.mrb[0].mxu0 }
 0x1ea   :  { %v296_v0 = vadd.f32 %v810_v62, %v295_v63  ;;  %v906_v2 = vpop.f32.mrb[1].mxu0 }
 0x1eb   :  { %v298_v4 = vpop.f32.mrb[2].mxu0 }
 0x1ec   :  { %v301_v5 = vmul.f32 0.5, %v296_v0  ;;  %v907_v6 = vpop.f32.mrb[3].mxu0 }
 0x1ee   :  { %1052 = vtanh.f32 %v301_v5 }
 0x1ef   :  { %1054 = vtanh.f32 %v446_v26 }
 0x1f8   :  { %v1053_v7 = vpop.eup %1052 }
 0x1f9   :  { %v303_v8 = vadd.f32 1.0, %v1053_v7  ;;  %v1055_v27 = vpop.eup %1054 }
 0x1fa   :  { %v448_v28 = vadd.f32 1.0, %v1055_v27 }
 0x1fb   :  { %v304_v9 = vmul.f32 %v303_v8, %v301_v5 }
 0x1fc   :  { %v449_v32 = vmul.f32 %v448_v28, %v446_v26 }
 0x1fd   :  { %v305_v10 = vpack.c.bf16 %v304_v9, %v304_v9  ;;  %v846_v9 = vld [vmem:[%s1442_s13] ss:$0 sm:$0xff] }
 0x1ff   :  { %925 = vmatmul.mubr.bf16.vlgmr.msra.gmra.mrb[0].mxu1 %v305_v10 }
 0x200   :  { %964 = vmatprep.mubr.msk.bf16.mxu1 %vm1137_vm0, %v1136_v3  ;;  %949 = vmatpush3.bf16.msra.mxu1 %v1032_v13 }
 0x201   :  { %950 = vmatprep.subr.bf16.mxu1 %v1136_v3 }
 0x204   :  { %951 = vmatpush3.bf16.msra.mxu1 %v1033_v14 }
 0x205   :  { %952 = vmatprep.subr.bf16.mxu1 %v1136_v3 }
 0x208   :  { %953 = vmatpush3.bf16.msra.mxu1 %v1034_v38 }
 0x209   :  { %954 = vmatprep.subr.bf16.mxu1 %v1136_v3 }
 0x20c   :  { %955 = vmatpush3.bf16.msra.mxu1 %v1035_v39 }
 0x20d   :  { %956 = vmatprep.subr.bf16.mxu1 %v1136_v3 }
 0x210   :  { %957 = vmatpush3.bf16.msra.mxu1 %v1036_v40 }
 0x211   :  { %958 = vmatprep.subr.bf16.mxu1 %v1136_v3 }
 0x214   :  { %959 = vmatpush3.bf16.msra.mxu1 %v1037_v41 }
 0x215   :  { %960 = vmatprep.subr.bf16.mxu1 %v1136_v3 }
 0x218   :  { %961 = vmatpush3.bf16.msra.mxu1 %v1038_v42 }
 0x219   :  { %962 = vmatprep.subr.bf16.mxu1 %v1136_v3 }
 0x21c   :  { %963 = vmatpush3.bf16.msra.mxu1 %v1039_v43 }
 0x2d2   :  { %v411_v30 = vpop.f32.mrb[0].mxu1 }
 0x2d3   :  { %v412_v31 = vadd.f32 %v816_v29, %v411_v30  ;;  %v926_v33 = vpop.f32.mrb[1].mxu1 }
 0x2d4   :  { %v414_v34 = vpop.f32.mrb[2].mxu1 }
 0x2d5   :  { %v450_v35 = vadd.f32 %v449_v32, %v412_v31  ;;  %v927_v36 = vpop.f32.mrb[3].mxu1 }
 0x2d7   :  { %v451_v37 = vpack.c.bf16 %v450_v35, %v450_v35 }
 0x2d9   :  { %945 = vmatmul.mubr.bf16.vlgmr.msra.gmra.mrb[4].mxu0 %v451_v37 }
 0x2da   :  { %984 = vmatprep.mubr.msk.bf16.mxu0 %vm1137_vm0, %v1136_v3  ;;  %969 = vmatpush3.bf16.msra.mxu0 %v1040_v44 }
 0x2db   :  { %970 = vmatprep.subr.bf16.mxu0 %v1136_v3 }
 0x2de   :  { %971 = vmatpush3.bf16.msra.mxu0 %v1041_v45 }
 0x2df   :  { %972 = vmatprep.subr.bf16.mxu0 %v1136_v3 }
 0x2e2   :  { %973 = vmatpush3.bf16.msra.mxu0 %v1042_v46 }
 0x2e3   :  { %974 = vmatprep.subr.bf16.mxu0 %v1136_v3 }
 0x2e6   :  { %975 = vmatpush3.bf16.msra.mxu0 %v1043_v57 }
 0x2e7   :  { %976 = vmatprep.subr.bf16.mxu0 %v1136_v3 }
 0x2ea   :  { %977 = vmatpush3.bf16.msra.mxu0 %v1044_v58 }
 0x2eb   :  { %978 = vmatprep.subr.bf16.mxu0 %v1136_v3 }
 0x2ee   :  { %979 = vmatpush3.bf16.msra.mxu0 %v1045_v59 }
 0x2ef   :  { %980 = vmatprep.subr.bf16.mxu0 %v1136_v3 }
 0x2f2   :  { %981 = vmatpush3.bf16.msra.mxu0 %v1046_v60 }
 0x2f3   :  { %982 = vmatprep.subr.bf16.mxu0 %v1136_v3 }
 0x2f6   :  { %983 = vmatpush3.bf16.msra.mxu0 %v1047_v61 }
 0x3ac   :  { %v557_v48 = vpop.f32.mrb[4].mxu0 }
 0x3ad   :  { %v558_v24 = vadd.f32 %v828_v47, %v557_v48  ;;  %v946_v49 = vpop.f32.mrb[5].mxu0 }
 0x3ae   :  { %v560_v50 = vpop.f32.mrb[6].mxu0 }
 0x3af   :  { %v563_v51 = vmul.f32 0.5, %v558_v24  ;;  %v947_v52 = vpop.f32.mrb[7].mxu0 }
 0x3b1   :  { %1056 = vtanh.f32 %v563_v51 }
 0x3bb   :  { %v1057_v19 = vpop.eup %1056 }
 0x3bc   :  { %v565_v53 = vadd.f32 1.0, %v1057_v19 }
 0x3be   :  { %v566_v54 = vmul.f32 %v565_v53, %v563_v51 }
 0x3c0   :  { %v567_v55 = vadd.f32 %v566_v54, %v412_v31 }
 0x3c2   :  { %v568_v56 = vpack.c.bf16 %v567_v55, %v567_v55 }
 0x3c4   :  { %965 = vmatmul.mubr.bf16.vlgmr.msra.gmra.mrb[4].mxu1 %v568_v56 }
 0x497   :  { %v674_v62 = vpop.f32.mrb[4].mxu1 }
 0x498   :  { %v675_v63 = vadd.f32 %v837_v1, %v674_v62  ;;  %v966_v0 = vpop.f32.mrb[5].mxu1 }
 0x499   :  { %v677_v2 = vpop.f32.mrb[6].mxu1 }
 0x49a   :  { %v680_v4 = vmul.f32 0.5, %v675_v63  ;;  %v967_v5 = vpop.f32.mrb[7].mxu1 }
 0x49c   :  { %1058 = vtanh.f32 %v680_v4 }
 0x4a6   :  { %v1059_v6 = vpop.eup %1058 }
 0x4a7   :  { %v682_v7 = vadd.f32 1.0, %v1059_v6 }
 0x4a9   :  { %v683_v8 = vmul.f32 %v682_v7, %v680_v4 }
 0x4ab   :  { %v684_v3 = vpack.c.bf16 %v683_v8, %v683_v8 }
 0x4ad   :  { %985 = vmatmul.mubr.bf16.vlgmr.msra.gmra.mrb[8].mxu0 %v684_v3 }
 0x580   :  { %v790_v10 = vpop.f32.mrb[8].mxu0 }
 0x581   :  { %v791_v11 = vadd.f32 %v846_v9, %v790_v10  ;;  %v986_v12 = vpop.f32.mrb[9].mxu0 }
 0x582   :  { %v793_v13 = vpop.f32.mrb[10].mxu0 }
 0x583   :  { %797 = vst.msk [vmem:[%s1443_s14] sm:$0xff] %vm796_vm15, %v791_v11  ;;  %v987_v14 = vpop.f32.mrb[11].mxu0 }
 0x584   :  { %802 = vsyncpa [#allocation3], 1 }
 0x585   :  { %803 = vsyncpa [#allocation5], 1 }

</bundles_post_ra>
